<compile_context>
chip_gen: v7x
topology: tpu7x:2x2x1
jax: 0.10.0
libtpu: 0.0.40
codegen_flags: <defaults>
</compile_context>

<pallas_src>
import jax
import jax.numpy as jnp
from jax.experimental import pallas as pl
from jax.experimental.pallas import tpu as pltpu


def _round_up(x, m):
    return (x + m - 1) // m * m


# ---------------------------------------------------------------------------
# Pallas kernel: the whole MLP decoder for one M-tile of rows.
#   refs = (x_ref, w0, b0, w1, b1, ..., wL, bL, o_ref)
# ---------------------------------------------------------------------------
def _mlp_decoder_kernel(*refs):
    x_ref = refs[0]
    o_ref = refs[-1]
    wb_refs = refs[1:-1]
    n_layers = len(wb_refs) // 2

    h = x_ref[...]                                   # (tile_m, K0) bf16
    for li in range(n_layers):
        w = wb_refs[2 * li][...]                     # (K, N) bf16, VMEM resident
        b = wb_refs[2 * li + 1][...]                 # (1, N) f32
        acc = jnp.dot(h, w, preferred_element_type=jnp.float32) + b
        if li + 1 < n_layers:
            h = jnp.maximum(acc, 0.0).astype(jnp.bfloat16)   # ReLU, back to bf16
        else:
            # sigmoid via EUP exp + EUP reciprocal, then clamp (matches
            # torch.sigmoid(...).clamp(1e-6, 1-1e-6)).
            sig = pl.reciprocal(1.0 + jnp.exp(-acc), approx=True)
            o_ref[...] = jnp.clip(sig, 1e-6, 1.0 - 1e-6).astype(o_ref.dtype)


def _fused_mlp(x_pad, ws, bs):
    """x_pad:(M_pad,K0) bf16, ws[i]:(K,N) bf16, bs[i]:(1,N) f32 -> (M_pad,N_last) f32."""
    m_pad, k0 = x_pad.shape
    n_out = ws[-1].shape[1]
    tile_m = m_pad if m_pad <= 512 else 512          # m_pad % 512 == 0 when large
    grid = (m_pad // tile_m,)

    in_specs = [pl.BlockSpec((tile_m, k0), lambda i: (i, 0))]
    flat_args = [x_pad]
    for w, b in zip(ws, bs):
        kd, nd = w.shape
        in_specs.append(pl.BlockSpec((kd, nd), lambda i: (0, 0)))   # resident
        in_specs.append(pl.BlockSpec((1, nd), lambda i: (0, 0)))    # resident
        flat_args.extend([w, b])

    return pl.pallas_call(
        _mlp_decoder_kernel,
        out_shape=jax.ShapeDtypeStruct((m_pad, n_out), jnp.float32),
        grid=grid,
        in_specs=in_specs,
        out_specs=pl.BlockSpec((tile_m, n_out), lambda i: (i, 0)),
        compiler_params=pltpu.CompilerParams(
            dimension_semantics=("parallel",),       # 2 TCs on v7x; no-op on v5e/v6e
            vmem_limit_bytes=32 * 1024 * 1024,
        ),
    )(*flat_args)


# ---------------------------------------------------------------------------
# Parameters: PyTorch nn.Linear layout (out_features, in_features), plus a
# one-time prep step (transpose / pad / bf16) hoisted out of the forward pass.
# ---------------------------------------------------------------------------
def make_params(key, latent_dim, c_dim, hidden_layers, hidden_dim, out_dim=784):
    dims = [latent_dim + c_dim] + [hidden_dim] * hidden_layers + [out_dim]
    params = []
    for i in range(len(dims) - 1):
        fan_in, fan_out = dims[i], dims[i + 1]
        key, k1, k2 = jax.random.split(key, 3)
        bound = 1.0 / jnp.sqrt(jnp.float32(fan_in))
        w = jax.random.uniform(k1, (fan_out, fan_in), jnp.float32, -bound, bound)
        b = jax.random.uniform(k2, (fan_out,), jnp.float32, -bound, bound)
        params.append((w, b))
    return params


def prepare_params(params):
    """Transpose to (in,out), pad first-K to 128 lanes and last-N to a multiple
    of 128 (lane-dense output), cast weights to bf16.  Done once."""
    n_layers = len(params)
    ws, bs = [], []
    for li, (w, b) in enumerate(params):
        wt = jnp.transpose(w)                                  # (in, out)
        if li == 0:
            k_pad = _round_up(wt.shape[0], 128)
            wt = jnp.pad(wt, ((0, k_pad - wt.shape[0]), (0, 0)))
        if li == n_layers - 1:
            n_pad = _round_up(wt.shape[1], 128)
            wt = jnp.pad(wt, ((0, 0), (0, n_pad - wt.shape[1])))
            b = jnp.pad(b, (0, n_pad - b.shape[0]))
        ws.append(wt.astype(jnp.bfloat16))
        bs.append(b.astype(jnp.float32).reshape(1, -1))
    return {"ws": ws, "bs": bs}


# ---------------------------------------------------------------------------
# Forward pass (matches MNISTCondDecoder.forward); jit-compiled.
# ---------------------------------------------------------------------------
def _forward(z, c, prep):
    lead = z.shape[:-1]                              # supports (B,D) and (B,S,D)
    x = jnp.concatenate([z, c], axis=-1).reshape(-1, z.shape[-1] + c.shape[-1])
    m, k0 = x.shape

    k0_pad = prep["ws"][0].shape[0]
    m_pad = _round_up(m, 8) if m <= 512 else _round_up(m, 512)
    x_pad = jnp.pad(x, ((0, m_pad - m), (0, k0_pad - k0))).astype(jnp.bfloat16)

    y = _fused_mlp(x_pad, prep["ws"], prep["bs"])    # (m_pad, 896) f32
    y = y[:m, : 28 * 28]
    return y.reshape(lead + (1, 28, 28))


mnist_cond_decoder = jax.jit(_forward)


def reference_decoder(z, c, params):
    """Pure-JAX f32 reference mirroring the PyTorch module."""
    x = jnp.concatenate([z, c], axis=-1)
    for w, b in params[:-1]:
        x = jax.nn.relu(x @ w.T + b)
    w, b = params[-1]
    p = x @ w.T + b
    d = jax.nn.sigmoid(p).reshape(z.shape[:-1] + (1, 28, 28))
    return jnp.clip(d, 1e-6, 1.0 - 1e-6)


if __name__ == "__main__":
    latent_dim, c_dim = 16, 10
    hidden_layers, hidden_dim = 3, 128
    batch = 2

    key = jax.random.PRNGKey(0)
    kz, kc, kp = jax.random.split(key, 3)
    z = jax.random.normal(kz, (batch, latent_dim), jnp.float32)
    c = jax.nn.one_hot(
        jax.random.randint(kc, (batch,), 0, c_dim), c_dim, dtype=jnp.float32)

    params = make_params(kp, latent_dim, c_dim, hidden_layers, hidden_dim)
    prep = prepare_params(params)            # one-time weight prep (hoisted)

    out = jax.block_until_ready(mnist_cond_decoder(z, c, prep))
    assert out.shape == (batch, 1, 28, 28), out.shape
    assert bool(jnp.all(jnp.isfinite(out)))
    assert bool(jnp.all((out >= 1e-6) & (out <= 1.0 - 1e-6)))   # clamp range

    ref = reference_decoder(z, c, params)
    assert float(jnp.max(jnp.abs(out - ref))) < 5e-2, "mismatch vs f32 reference"
    print("KERNEL_OK")
</pallas_src>

<mosaic_0001>
module attributes {stable_mosaic.version = 11 : i64} {
  func.func @_mlp_decoder_kernel(%arg0: i32, %arg1: memref<8x128xbf16, #tpu.memory_space<vmem>>, %arg2: memref<128x128xbf16, #tpu.memory_space<vmem>>, %arg3: memref<1x128xf32, #tpu.memory_space<vmem>>, %arg4: memref<128x128xbf16, #tpu.memory_space<vmem>>, %arg5: memref<1x128xf32, #tpu.memory_space<vmem>>, %arg6: memref<128x128xbf16, #tpu.memory_space<vmem>>, %arg7: memref<1x128xf32, #tpu.memory_space<vmem>>, %arg8: memref<128x896xbf16, #tpu.memory_space<vmem>>, %arg9: memref<1x896xf32, #tpu.memory_space<vmem>>, %arg10: memref<8x896xf32, #tpu.memory_space<vmem>>) attributes {dimension_semantics = [#tpu.dimension_semantics<parallel>], iteration_bounds = array<i64: 1>, scalar_prefetch = 0 : i64, scratch_operands = 0 : i64, tpu.core_type = #tpu.core_type<tc>, window_params = [{transform_indices = @transform_0, window_bounds = array<i64: 8, 128>}, {pipeline_mode = #tpu.pipeline_mode<synchronous>, transform_indices = @transform_1, window_bounds = array<i64: 128, 128>}, {pipeline_mode = #tpu.pipeline_mode<synchronous>, transform_indices = @transform_2, window_bounds = array<i64: 1, 128>}, {pipeline_mode = #tpu.pipeline_mode<synchronous>, transform_indices = @transform_3, window_bounds = array<i64: 128, 128>}, {pipeline_mode = #tpu.pipeline_mode<synchronous>, transform_indices = @transform_4, window_bounds = array<i64: 1, 128>}, {pipeline_mode = #tpu.pipeline_mode<synchronous>, transform_indices = @transform_5, window_bounds = array<i64: 128, 128>}, {pipeline_mode = #tpu.pipeline_mode<synchronous>, transform_indices = @transform_6, window_bounds = array<i64: 1, 128>}, {pipeline_mode = #tpu.pipeline_mode<synchronous>, transform_indices = @transform_7, window_bounds = array<i64: 128, 896>}, {pipeline_mode = #tpu.pipeline_mode<synchronous>, transform_indices = @transform_8, window_bounds = array<i64: 1, 896>}, {transform_indices = @transform_9, window_bounds = array<i64: 8, 896>}]} {
    %c0 = arith.constant 0 : index
    %c0_0 = arith.constant 0 : index
    %0 = vector.load %arg1[%c0, %c0_0] : memref<8x128xbf16, #tpu.memory_space<vmem>>, vector<8x128xbf16>
    %c0_1 = arith.constant 0 : index
    %c0_2 = arith.constant 0 : index
    %1 = vector.load %arg2[%c0_1, %c0_2] : memref<128x128xbf16, #tpu.memory_space<vmem>>, vector<128x128xbf16>
    %c0_3 = arith.constant 0 : index
    %c0_4 = arith.constant 0 : index
    %2 = vector.load %arg3[%c0_3, %c0_4] : memref<1x128xf32, #tpu.memory_space<vmem>>, vector<1x128xf32>
    %cst = arith.constant dense<0.000000e+00> : vector<8x128xf32>
    %3 = tpu.matmul %0, %1, %cst {dimension_numbers = #tpu.dot_dimension_numbers<[1], [0], [0], [1], [0, 0, 1, 1], [], []>} : vector<8x128xbf16>, vector<128x128xbf16>, vector<8x128xf32> -> vector<8x128xf32>
    %4 = vector.broadcast %2 : vector<1x128xf32> to vector<8x128xf32>
    %5 = arith.addf %3, %4 : vector<8x128xf32>
    %cst_5 = arith.constant 0.000000e+00 : f32
    %6 = vector.broadcast %cst_5 : f32 to vector<8x128xf32>
    %7 = arith.maximumf %5, %6 : vector<8x128xf32>
    %8 = arith.truncf %7 : vector<8x128xf32> to vector<8x128xbf16>
    %c0_6 = arith.constant 0 : index
    %c0_7 = arith.constant 0 : index
    %9 = vector.load %arg4[%c0_6, %c0_7] : memref<128x128xbf16, #tpu.memory_space<vmem>>, vector<128x128xbf16>
    %c0_8 = arith.constant 0 : index
    %c0_9 = arith.constant 0 : index
    %10 = vector.load %arg5[%c0_8, %c0_9] : memref<1x128xf32, #tpu.memory_space<vmem>>, vector<1x128xf32>
    %cst_10 = arith.constant dense<0.000000e+00> : vector<8x128xf32>
    %11 = tpu.matmul %8, %9, %cst_10 {dimension_numbers = #tpu.dot_dimension_numbers<[1], [0], [0], [1], [0, 0, 1, 1], [], []>} : vector<8x128xbf16>, vector<128x128xbf16>, vector<8x128xf32> -> vector<8x128xf32>
    %12 = vector.broadcast %10 : vector<1x128xf32> to vector<8x128xf32>
    %13 = arith.addf %11, %12 : vector<8x128xf32>
    %cst_11 = arith.constant 0.000000e+00 : f32
    %14 = vector.broadcast %cst_11 : f32 to vector<8x128xf32>
    %15 = arith.maximumf %13, %14 : vector<8x128xf32>
    %16 = arith.truncf %15 : vector<8x128xf32> to vector<8x128xbf16>
    %c0_12 = arith.constant 0 : index
    %c0_13 = arith.constant 0 : index
    %17 = vector.load %arg6[%c0_12, %c0_13] : memref<128x128xbf16, #tpu.memory_space<vmem>>, vector<128x128xbf16>
    %c0_14 = arith.constant 0 : index
    %c0_15 = arith.constant 0 : index
    %18 = vector.load %arg7[%c0_14, %c0_15] : memref<1x128xf32, #tpu.memory_space<vmem>>, vector<1x128xf32>
    %cst_16 = arith.constant dense<0.000000e+00> : vector<8x128xf32>
    %19 = tpu.matmul %16, %17, %cst_16 {dimension_numbers = #tpu.dot_dimension_numbers<[1], [0], [0], [1], [0, 0, 1, 1], [], []>} : vector<8x128xbf16>, vector<128x128xbf16>, vector<8x128xf32> -> vector<8x128xf32>
    %20 = vector.broadcast %18 : vector<1x128xf32> to vector<8x128xf32>
    %21 = arith.addf %19, %20 : vector<8x128xf32>
    %cst_17 = arith.constant 0.000000e+00 : f32
    %22 = vector.broadcast %cst_17 : f32 to vector<8x128xf32>
    %23 = arith.maximumf %21, %22 : vector<8x128xf32>
    %24 = arith.truncf %23 : vector<8x128xf32> to vector<8x128xbf16>
    %c0_18 = arith.constant 0 : index
    %c0_19 = arith.constant 0 : index
    %25 = vector.load %arg8[%c0_18, %c0_19] : memref<128x896xbf16, #tpu.memory_space<vmem>>, vector<128x896xbf16>
    %c0_20 = arith.constant 0 : index
    %c0_21 = arith.constant 0 : index
    %26 = vector.load %arg9[%c0_20, %c0_21] : memref<1x896xf32, #tpu.memory_space<vmem>>, vector<1x896xf32>
    %cst_22 = arith.constant dense<0.000000e+00> : vector<8x896xf32>
    %27 = tpu.matmul %24, %25, %cst_22 {dimension_numbers = #tpu.dot_dimension_numbers<[1], [0], [0], [1], [0, 0, 1, 1], [], []>} : vector<8x128xbf16>, vector<128x896xbf16>, vector<8x896xf32> -> vector<8x896xf32>
    %28 = vector.broadcast %26 : vector<1x896xf32> to vector<8x896xf32>
    %29 = arith.addf %27, %28 : vector<8x896xf32>
    %cst_23 = arith.constant 0.000000e+00 : f32
    %30 = vector.broadcast %cst_23 : f32 to vector<8x896xf32>
    %31 = arith.subf %30, %29 : vector<8x896xf32>
    %32 = math.exp %31 : vector<8x896xf32>
    %cst_24 = arith.constant 1.000000e+00 : f32
    %33 = vector.broadcast %cst_24 : f32 to vector<8x896xf32>
    %34 = arith.addf %33, %32 : vector<8x896xf32>
    %35 = tpu.reciprocal %34 {approx = true} : vector<8x896xf32> -> vector<8x896xf32>
    %cst_25 = arith.constant 9.99999997E-7 : f32
    %cst_26 = arith.constant 0.999998986 : f32
    %36 = vector.broadcast %cst_25 : f32 to vector<8x896xf32>
    %37 = arith.maximumf %36, %35 : vector<8x896xf32>
    %38 = vector.broadcast %cst_26 : f32 to vector<8x896xf32>
    %39 = arith.minimumf %38, %37 : vector<8x896xf32>
    %c0_27 = arith.constant 0 : index
    %c0_28 = arith.constant 0 : index
    %40 = vector.load %arg10[%c0_27, %c0_28] : memref<8x896xf32, #tpu.memory_space<vmem>>, vector<8x896xf32>
    tpu.vector_store %arg10[%c0_27, %c0_28], %39 {strides = array<i32>} : memref<8x896xf32, #tpu.memory_space<vmem>>, vector<8x896xf32>,
    return
  }
  func.func @transform_0(%arg0: i32) -> (i32, i32) {
    %c0_i32 = arith.constant 0 : i32
    %c0_i32_0 = arith.constant 0 : i32
    return %arg0, %c0_i32 : i32, i32
  }
  func.func @transform_1(%arg0: i32) -> (i32, i32) {
    %c0_i32 = arith.constant 0 : i32
    %c0_i32_0 = arith.constant 0 : i32
    %c0_i32_1 = arith.constant 0 : i32
    return %c0_i32, %c0_i32_0 : i32, i32
  }
  func.func @transform_2(%arg0: i32) -> (i32, i32) {
    %c0_i32 = arith.constant 0 : i32
    %c0_i32_0 = arith.constant 0 : i32
    %c0_i32_1 = arith.constant 0 : i32
    return %c0_i32, %c0_i32_0 : i32, i32
  }
  func.func @transform_3(%arg0: i32) -> (i32, i32) {
    %c0_i32 = arith.constant 0 : i32
    %c0_i32_0 = arith.constant 0 : i32
    %c0_i32_1 = arith.constant 0 : i32
    return %c0_i32, %c0_i32_0 : i32, i32
  }
  func.func @transform_4(%arg0: i32) -> (i32, i32) {
    %c0_i32 = arith.constant 0 : i32
    %c0_i32_0 = arith.constant 0 : i32
    %c0_i32_1 = arith.constant 0 : i32
    return %c0_i32, %c0_i32_0 : i32, i32
  }
  func.func @transform_5(%arg0: i32) -> (i32, i32) {
    %c0_i32 = arith.constant 0 : i32
    %c0_i32_0 = arith.constant 0 : i32
    %c0_i32_1 = arith.constant 0 : i32
    return %c0_i32, %c0_i32_0 : i32, i32
  }
  func.func @transform_6(%arg0: i32) -> (i32, i32) {
    %c0_i32 = arith.constant 0 : i32
    %c0_i32_0 = arith.constant 0 : i32
    %c0_i32_1 = arith.constant 0 : i32
    return %c0_i32, %c0_i32_0 : i32, i32
  }
  func.func @transform_7(%arg0: i32) -> (i32, i32) {
    %c0_i32 = arith.constant 0 : i32
    %c0_i32_0 = arith.constant 0 : i32
    %c0_i32_1 = arith.constant 0 : i32
    return %c0_i32, %c0_i32_0 : i32, i32
  }
  func.func @transform_8(%arg0: i32) -> (i32, i32) {
    %c0_i32 = arith.constant 0 : i32
    %c0_i32_0 = arith.constant 0 : i32
    %c0_i32_1 = arith.constant 0 : i32
    return %c0_i32, %c0_i32_0 : i32, i32
  }
  func.func @transform_9(%arg0: i32) -> (i32, i32) {
    %c0_i32 = arith.constant 0 : i32
    %c0_i32_0 = arith.constant 0 : i32
    return %arg0, %c0_i32 : i32, i32
  }
}

</mosaic_0001>

<bundles_post_ra>
// kernel: _forward.1
= control target key start
LH: loop header
LB: loop body
LE: loop exit
PB: predicated region body
PF: predicated region fallthrough
CT: control target
= control target key end

     0   :  { %14 = vsyncpa [#allocation3], 0  ;;  %s1687_s0 = inlined_call_operand.vmem [shape: bf16[8,128], index: 0, kind: input, shape index: {}]   ;;  %s1688_s1 = inlined_call_operand.hbm [shape: bf16[128,128], index: 1, kind: input, shape index: {}]   ;;  %s1689_s2 = inlined_call_operand.vmem [shape: f32[1,128], index: 2, kind: input, shape index: {}]   ;;  %s1690_s3 = inlined_call_operand.hbm [shape: bf16[128,128], index: 3, kind: input, shape index: {}]   ;;  %s1691_s4 = inlined_call_operand.vmem [shape: f32[1,128], index: 4, kind: input, shape index: {}]   ;;  %s1692_s5 = inlined_call_operand.hbm [shape: bf16[128,128], index: 5, kind: input, shape index: {}]   ;;  %s1693_s6 = inlined_call_operand.vmem [shape: f32[1,128], index: 6, kind: input, shape index: {}]   ;;  %s1694_s7 = inlined_call_operand.hbm [shape: bf16[128,896], index: 7, kind: input, shape index: {}]   ;;  %s1695_s8 = inlined_call_operand.vmem [shape: f32[1,896], index: 8, kind: input, shape index: {}]   ;;  %s1696_s9 = inlined_call_operand.vmem [shape: f32[8,896], index: 9, kind: output, shape index: {}]  }
   0x1   :  { %15 = vsyncpa [#allocation5], 0 }
   0x2   :  { %16 = vsyncpa [#allocation8], 0  ;;  %s1479_s30 = smov [#allocation4]   ;;  %s1480_s11 = smov [#allocation2]  }
   0x3   :  { %s38_s10 = sshll.u32 %s1479_s30, 4  ;;  %s24_s12 = sshll.u32 %s1480_s11, 4  ;;  %s39_s10 = int_to_ptr.vmem [resolvable:$true] %s38_s10  ;;  %s1540_s12 = int_to_ptr.vmem [resolvable:$true] %s24_s12 }
   0x4   :  { %s1385_s15 = scalar_lea.hbm %s1690_s3, 1024 }
   0x5   :  { %p1386_p0 = scmp.ne.s32.totalorder %s1690_s3, %s1385_s15  ;;  %p1389_p1 = scmp.lt.u32.totalorder %s1385_s15, %s1690_s3 }
   0x7   :  { %p1391_p2 = pnand %p1389_p1, %p1386_p0 }
   0x9   :  { %1394 = shalt.err (!%p1391_p2)
}
   0xa   :  { %s1395_s20 = scalar_lea.vmem %s39_s10, 1024  ;;  %p1400_p4 = scmp.lt.s32.totalorder %s39_s10, %s39_s10 }
   0xb   :  { %p1396_p3 = scmp.ne.s32.totalorder %s39_s10, %s1395_s20  ;;  %p1401_p5 = scmp.lt.s32.totalorder %s1395_s20, %s1395_s20 }
   0xd   :  { %p1402_p6 = por %p1401_p5, %p1400_p4 }
   0xf   :  { %p1403_p7 = pnand %p1402_p6, %p1396_p3 }
  0x11   :  { %1406 = shalt.err (!%p1403_p7)
}
  0x12   :  { %s1481_s21 = smov 64   ;;  %s1482_s22 = smov 4  }
  0x13   :  { %44 = dma.hbm_to_vmem [thread:$0]  %s1690_s3, 1024, %s39_s10, [#allocation5], %s1481_s21, %s1481_s21, %s1482_s22  }
  0x14   :  { %s1407_s27 = scalar_lea.hbm %s1688_s1, 1024 }
  0x15   :  { %p1408_p8 = scmp.ne.s32.totalorder %s1688_s1, %s1407_s27  ;;  %p1411_p9 = scmp.lt.u32.totalorder %s1407_s27, %s1688_s1 }
  0x17   :  { %p1413_p10 = pnand %p1411_p9, %p1408_p8 }
  0x19   :  { %1416 = shalt.err (!%p1413_p10)
}
  0x1a   :  { %s1417_s13 = scalar_lea.vmem %s1540_s12, 1024  ;;  %p1422_p12 = scmp.lt.s32.totalorder %s1540_s12, %s1540_s12 }
  0x1b   :  { %p1418_p11 = scmp.ne.s32.totalorder %s1540_s12, %s1417_s13  ;;  %p1423_p13 = scmp.lt.s32.totalorder %s1417_s13, %s1417_s13 }
  0x1d   :  { %p1424_p0 = por %p1423_p13, %p1422_p12 }
  0x1f   :  { %p1425_p1 = pnand %p1424_p0, %p1418_p11 }
  0x21   :  { %1428 = shalt.err (!%p1425_p1)
}
  0x22   :  { %30 = dma.hbm_to_vmem [thread:$0]  %s1688_s1, 1024, %s1540_s12, [#allocation3], %s1481_s21, %s1481_s21, %s1482_s22  }
  0x23   :  { %s1483_s14 = smov [#allocation6]   ;;  %s1484_s16 = smov [#allocation7]  }
  0x24   :  { %s52_s15 = sshll.u32 %s1483_s14, 4  ;;  %s66_s17 = sshll.u32 %s1484_s16, 4  ;;  %s53_s15 = int_to_ptr.vmem [resolvable:$true] %s52_s15  ;;  %s1577_s17 = int_to_ptr.vmem [resolvable:$true] %s66_s17 }
  0x25   :  { %s1429_s20 = scalar_lea.hbm %s1692_s5, 1024 }
  0x26   :  { %p1430_p2 = scmp.ne.s32.totalorder %s1692_s5, %s1429_s20  ;;  %p1433_p3 = scmp.lt.u32.totalorder %s1429_s20, %s1692_s5 }
  0x28   :  { %p1435_p4 = pnand %p1433_p3, %p1430_p2 }
  0x2a   :  { %1438 = shalt.err (!%p1435_p4)
}
  0x2b   :  { %s1439_s1 = scalar_lea.vmem %s53_s15, 1024  ;;  %p1444_p6 = scmp.lt.s32.totalorder %s53_s15, %s53_s15 }
  0x2c   :  { %p1440_p5 = scmp.ne.s32.totalorder %s53_s15, %s1439_s1  ;;  %p1445_p7 = scmp.lt.s32.totalorder %s1439_s1, %s1439_s1 }
  0x2e   :  { %p1446_p8 = por %p1445_p7, %p1444_p6 }
  0x30   :  { %p1447_p9 = pnand %p1446_p8, %p1440_p5 }
  0x32   :  { %1450 = shalt.err (!%p1447_p9)
}
  0x33   :  { %58 = dma.hbm_to_vmem [thread:$0]  %s1692_s5, 1024, %s53_s15, [#allocation5], %s1481_s21, %s1481_s21, %s1482_s22  }
  0x34   :  { %s1451_s30 = scalar_lea.hbm %s1694_s7, 7168 }
  0x35   :  { %p1452_p10 = scmp.ne.s32.totalorder %s1694_s7, %s1451_s30  ;;  %p1455_p11 = scmp.lt.u32.totalorder %s1451_s30, %s1694_s7 }
  0x37   :  { %p1457_p12 = pnand %p1455_p11, %p1452_p10 }
  0x39   :  { %1460 = shalt.err (!%p1457_p12)
}
  0x3a   :  { %s1461_s14 = scalar_lea.vmem %s1577_s17, 7168  ;;  %p1466_p0 = scmp.lt.s32.totalorder %s1577_s17, %s1577_s17 }
  0x3b   :  { %p1462_p13 = scmp.ne.s32.totalorder %s1577_s17, %s1461_s14  ;;  %p1467_p1 = scmp.lt.s32.totalorder %s1461_s14, %s1461_s14 }
  0x3d   :  { %p1468_p2 = por %p1467_p1, %p1466_p0 }
  0x3f   :  { %p1469_p3 = pnand %p1468_p2, %p1462_p13 }
  0x41   :  { %1472 = shalt.err (!%p1469_p3)
}
  0x42   :  { %s1485_s5 = smov 448   ;;  %s1486_s21 = smov 28  }
  0x43   :  { %72 = dma.hbm_to_vmem [thread:$0]  %s1694_s7, 7168, %s1577_s17, [#allocation8], %s1485_s5, %s1485_s5, %s1486_s21  }
  0x44   :  { %1473 = dma.done.wait [#allocation3], 1024  }
  0x45   :  { %1474 = vsyncadd [#allocation3], 4294966272 }
  0x46   :  { %1475 = dma.done.wait [#allocation5], 2048  }
  0x47   :  { %1476 = vsyncadd [#allocation5], 4294965248 }
  0x48   :  { %1477 = dma.done.wait [#allocation8], 7168  }
  0x49   :  { %1478 = vsyncadd [#allocation8], 4294960128  ;;  %v1487_v0 = vmov 0.0   ;;  %vm1488_vm0 = vmmov 0   ;;  %v1253_v1 = vld [vmem:[#allocation2] sm:$0xff]   ;;  %v1254_v2 = vld [vmem:[#allocation2 + $0x8] sm:$0xff]  }
  0x4a   :  { %1162 = vmatprep.subr.bf16.mxu0 %v1487_v0  ;;  %1178 = vmatprep.mubr.msk.bf16.mxu0 %vm1488_vm0, %v1487_v0  ;;  %v1255_v3 = vld [vmem:[#allocation2 + $0x10] sm:$0xff]   ;;  %v1261_v4 = vld [vmem:[#allocation4] sm:$0xff]   ;;  %v1256_v5 = vld [vmem:[#allocation2 + $0x18] sm:$0xff]  }
  0x4b   :  { %1182 = vmatprep.subr.bf16.mxu1 %v1487_v0  ;;  %1198 = vmatprep.mubr.msk.bf16.mxu1 %vm1488_vm0, %v1487_v0  ;;  %v1262_v6 = vld [vmem:[#allocation4 + $0x8] sm:$0xff]   ;;  %v1257_v7 = vld [vmem:[#allocation2 + $0x20] sm:$0xff]   ;;  %v1263_v8 = vld [vmem:[#allocation4 + $0x10] sm:$0xff]  }
  0x4c   :  { %1163 = vmatpush3.bf16.msra.mxu0 %v1253_v1  ;;  %1183 = vmatpush3.bf16.msra.mxu1 %v1261_v4  ;;  %v1258_v9 = vld [vmem:[#allocation2 + $0x28] sm:$0xff]   ;;  %v1264_v10 = vld [vmem:[#allocation4 + $0x18] sm:$0xff]   ;;  %v1259_v11 = vld [vmem:[#allocation2 + $0x30] sm:$0xff]  }
  0x4d   :  { %1164 = vmatprep.subr.bf16.mxu0 %v1487_v0  ;;  %1184 = vmatprep.subr.bf16.mxu1 %v1487_v0  ;;  %v1265_v12 = vld [vmem:[#allocation4 + $0x20] sm:$0xff]   ;;  %v1260_v13 = vld [vmem:[#allocation2 + $0x38] sm:$0xff]   ;;  %v1266_v14 = vld [vmem:[#allocation4 + $0x28] sm:$0xff]  }
  0x4e   :  { %v88_v15 = vld [vmem:[%s1687_s0] sm:$0xf]  ;;  %v1267_v16 = vld [vmem:[#allocation4 + $0x30] sm:$0xff]   ;;  %v1268_v17 = vld [vmem:[#allocation4 + $0x38] sm:$0xff]  }
  0x4f   :  { %v1269_v18 = vld [vmem:[#allocation6] sm:$0xff]   ;;  %v1270_v19 = vld [vmem:[#allocation6 + $0x8] sm:$0xff]   ;;  %v1271_v20 = vld [vmem:[#allocation6 + $0x10] sm:$0xff]  }
  0x50   :  { %1165 = vmatpush3.bf16.msra.mxu0 %v1254_v2  ;;  %1185 = vmatpush3.bf16.msra.mxu1 %v1262_v6  ;;  %v1272_v21 = vld [vmem:[#allocation6 + $0x18] sm:$0xff]   ;;  %v1273_v22 = vld [vmem:[#allocation6 + $0x20] sm:$0xff]   ;;  %v1274_v23 = vld [vmem:[#allocation6 + $0x28] sm:$0xff]  }
  0x51   :  { %1166 = vmatprep.subr.bf16.mxu0 %v1487_v0  ;;  %1186 = vmatprep.subr.bf16.mxu1 %v1487_v0  ;;  %v1043_v24 = vld [vmem:[%s1689_s2] ss:$0 sm:$0xff]  ;;  %v1275_v32 = vld [vmem:[#allocation6 + $0x30] sm:$0xff]   ;;  %v1276_v33 = vld [vmem:[#allocation6 + $0x38] sm:$0xff]  }
  0x52   :  { %v1277_v34 = vld [vmem:[#allocation7] ss:$28 sps:$4 sm:$0xff]   ;;  %v1282_v36 = vld [vmem:[#allocation7 + $0xc] ss:$28 sps:$4 sm:$0xff]   ;;  %v1283_v38 = vld [vmem:[#allocation7 + $0x38] ss:$28 sps:$4 sm:$0xff]  }
  0x53   :  { %v1279_v35 = vld [vmem:[#allocation7 + $0x4] ss:$28 sps:$4 sm:$0xff]   ;;  %v1285_v37 = vld [vmem:[#allocation7 + $0x3c] ss:$28 sps:$4 sm:$0xff]   ;;  %v1291_v39 = vld [vmem:[#allocation7 + $0x74] ss:$28 sps:$4 sm:$0xff]  }
  0x54   :  { %1167 = vmatpush3.bf16.msra.mxu0 %v1255_v3  ;;  %1187 = vmatpush3.bf16.msra.mxu1 %v1263_v8  ;;  %v1289_v40 = vld [vmem:[#allocation7 + $0x70] ss:$28 sps:$4 sm:$0xff]   ;;  %v1295_v42 = vld [vmem:[#allocation7 + $0xa8] ss:$28 sps:$4 sm:$0xff]   ;;  %v1301_v44 = vld [vmem:[#allocation7 + $0xe0] ss:$28 sps:$4 sm:$0xff]  }
  0x55   :  { %1168 = vmatprep.subr.bf16.mxu0 %v1487_v0  ;;  %1188 = vmatprep.subr.bf16.mxu1 %v1487_v0  ;;  %v1297_v41 = vld [vmem:[#allocation7 + $0xac] ss:$28 sps:$4 sm:$0xff]   ;;  %v1303_v43 = vld [vmem:[#allocation7 + $0xe4] ss:$28 sps:$4 sm:$0xff]   ;;  %v1309_v45 = vld [vmem:[#allocation7 + $0x11c] ss:$28 sps:$4 sm:$0xff]  }
  0x56   :  { %v1307_v46 = vld [vmem:[#allocation7 + $0x118] ss:$28 sps:$4 sm:$0xff]   ;;  %v1313_v48 = vld [vmem:[#allocation7 + $0x150] ss:$28 sps:$4 sm:$0xff]   ;;  %v1052_v49 = vld [vmem:[%s1691_s4] ss:$0 sm:$0xff] }
  0x57   :  { %v1315_v47 = vld [vmem:[#allocation7 + $0x154] ss:$28 sps:$4 sm:$0xff]   ;;  %v1280_v56 = vld [vmem:[#allocation7 + $0x8] ss:$28 sps:$4 sm:$0xff]   ;;  %v1286_v59 = vld [vmem:[#allocation7 + $0x40] ss:$28 sps:$4 sm:$0xff]  }
  0x58   :  { %1169 = vmatpush3.bf16.msra.mxu0 %v1256_v5  ;;  %1189 = vmatpush3.bf16.msra.mxu1 %v1264_v10  ;;  %v1288_v58 = vld [vmem:[#allocation7 + $0x44] ss:$28 sps:$4 sm:$0xff]   ;;  %v1294_v60 = vld [vmem:[#allocation7 + $0x7c] ss:$28 sps:$4 sm:$0xff]   ;;  %v1300_v62 = vld [vmem:[#allocation7 + $0xb4] ss:$28 sps:$4 sm:$0xff]  }
  0x59   :  { %1170 = vmatprep.subr.bf16.mxu0 %v1487_v0  ;;  %1190 = vmatprep.subr.bf16.mxu1 %v1487_v0  ;;  %v1292_v61 = vld [vmem:[#allocation7 + $0x78] ss:$28 sps:$4 sm:$0xff]   ;;  %v1298_v63 = vld [vmem:[#allocation7 + $0xb0] ss:$28 sps:$4 sm:$0xff]   ;;  %v1304_v2 = vld [vmem:[#allocation7 + $0xe8] ss:$28 sps:$4 sm:$0xff]  }
  0x5a   :  { %v1306_v1 = vld [vmem:[#allocation7 + $0xec] ss:$28 sps:$4 sm:$0xff]   ;;  %v1312_v3 = vld [vmem:[#allocation7 + $0x124] ss:$28 sps:$4 sm:$0xff]   ;;  %v1318_v5 = vld [vmem:[#allocation7 + $0x15c] ss:$28 sps:$4 sm:$0xff]  }
  0x5b   :  { %v1310_v4 = vld [vmem:[#allocation7 + $0x120] ss:$28 sps:$4 sm:$0xff]   ;;  %v1316_v6 = vld [vmem:[#allocation7 + $0x158] ss:$28 sps:$4 sm:$0xff]   ;;  %v1322_v10 = vld [vmem:[#allocation7 + $0x190] ss:$28 sps:$4 sm:$0xff]  }
  0x5c   :  { %1171 = vmatpush3.bf16.msra.mxu0 %v1257_v7  ;;  %1191 = vmatpush3.bf16.msra.mxu1 %v1265_v12  ;;  %v1321_v7 = vld [vmem:[#allocation7 + $0x18c] ss:$28 sps:$4 sm:$0xff]   ;;  %v1324_v8 = vld [vmem:[#allocation7 + $0x194] ss:$28 sps:$4 sm:$0xff]   ;;  %v1489_v12 = vmov 0  }
  0x5d   :  { %1172 = vmatprep.subr.bf16.mxu0 %v1487_v0  ;;  %1192 = vmatprep.subr.bf16.mxu1 %v1487_v0 }
  0x60   :  { %1173 = vmatpush3.bf16.msra.mxu0 %v1258_v9  ;;  %1193 = vmatpush3.bf16.msra.mxu1 %v1266_v14  ;;  %v1319_v9 = vld [vmem:[#allocation7 + $0x188] ss:$28 sps:$4 sm:$0xff]  }
  0x61   :  { %1174 = vmatprep.subr.bf16.mxu0 %v1487_v0  ;;  %1194 = vmatprep.subr.bf16.mxu1 %v1487_v0 }
  0x64   :  { %1175 = vmatpush3.bf16.msra.mxu0 %v1259_v11  ;;  %1195 = vmatpush3.bf16.msra.mxu1 %v1267_v16  ;;  %v1327_v11 = vld [vmem:[#allocation7 + $0x14] ss:$28 sps:$4 sm:$0xff]  }
  0x65   :  { %1176 = vmatprep.subr.bf16.mxu0 %v1487_v0  ;;  %1196 = vmatprep.subr.bf16.mxu1 %v1487_v0 }
  0x68   :  { %1177 = vmatpush3.bf16.msra.mxu0 %v1260_v13  ;;  %1197 = vmatpush3.bf16.msra.mxu1 %v1268_v17  ;;  %v1061_v13 = vld [vmem:[%s1693_s6] ss:$0 sm:$0xff] }
  0x69   :  { %1202 = vmatprep.subr.bf16.mxu0 %v1487_v0  ;;  %817 = vmatprep.subr.bf16.mxu1 %v1279_v35  ;;  %v1347_v35 = vld [vmem:[#allocation7 + $0x12c] ss:$28 sps:$4 sm:$0xff]  }
  0x6b   :  { %1179 = vmatmul.mubr.bf16.vlgmr.msra.gmra.mrb[0].mxu0 %v88_v15 }
  0x6c   :  { %1218 = vmatprep.mubr.msk.bf16.mxu0 %vm1488_vm0, %v1487_v0  ;;  %1203 = vmatpush3.bf16.msra.mxu0 %v1269_v18 }
  0x6d   :  { %1204 = vmatprep.subr.bf16.mxu0 %v1487_v0 }
  0x70   :  { %1205 = vmatpush3.bf16.msra.mxu0 %v1270_v19 }
  0x71   :  { %1206 = vmatprep.subr.bf16.mxu0 %v1487_v0 }
  0x74   :  { %1207 = vmatpush3.bf16.msra.mxu0 %v1271_v20  ;;  %v1325_v20 = vld [vmem:[#allocation7 + $0x10] ss:$28 sps:$4 sm:$0xff]  }
  0x75   :  { %1208 = vmatprep.subr.bf16.mxu0 %v1487_v0 }
  0x78   :  { %1209 = vmatpush3.bf16.msra.mxu0 %v1272_v21  ;;  %v1328_v21 = vld [vmem:[#allocation7 + $0x18] ss:$28 sps:$4 sm:$0xff]  }
  0x79   :  { %1210 = vmatprep.subr.bf16.mxu0 %v1487_v0 }
  0x7c   :  { %1211 = vmatpush3.bf16.msra.mxu0 %v1273_v22 }
  0x7d   :  { %1212 = vmatprep.subr.bf16.mxu0 %v1487_v0 }
  0x80   :  { %1213 = vmatpush3.bf16.msra.mxu0 %v1274_v23  ;;  %v1331_v23 = vld [vmem:[#allocation7 + $0x4c] ss:$28 sps:$4 sm:$0xff]  }
  0x81   :  { %1214 = vmatprep.subr.bf16.mxu0 %v1487_v0 }
  0x84   :  { %1215 = vmatpush3.bf16.msra.mxu0 %v1275_v32  ;;  %v1343_v32 = vld [vmem:[#allocation7 + $0xf4] ss:$28 sps:$4 sm:$0xff]  }
  0x85   :  { %1216 = vmatprep.subr.bf16.mxu0 %v1487_v0 }
  0x88   :  { %1217 = vmatpush3.bf16.msra.mxu0 %v1276_v33  ;;  %v1341_v33 = vld [vmem:[#allocation7 + $0xf0] ss:$28 sps:$4 sm:$0xff]  }
  0x89   :  { %858 = vmatprep.subr.bf16.mxu0 %v1282_v36  ;;  %v1345_v36 = vld [vmem:[#allocation7 + $0x128] ss:$28 sps:$4 sm:$0xff]  }
 0x13e   :  { %v194_v25 = vpop.f32.mrb[0].mxu0 }
 0x13f   :  { %v195_v26 = vadd.f32 %v1043_v24, %v194_v25  ;;  %v1180_v27 = vpop.f32.mrb[1].mxu0  ;;  %v1329_v24 = vld [vmem:[#allocation7 + $0x48] ss:$28 sps:$4 sm:$0xff]   ;;  %v1332_v25 = vld [vmem:[#allocation7 + $0x50] ss:$28 sps:$4 sm:$0xff]  }
 0x140   :  { %v197_v28 = vpop.f32.mrb[2].mxu0  ;;  %v1333_v27 = vld [vmem:[#allocation7 + $0x80] ss:$28 sps:$4 sm:$0xff]  }
 0x141   :  { %v200_v29 = vmax.f32 %v195_v26, 0.0  ;;  %v1181_v30 = vpop.f32.mrb[3].mxu0  ;;  %v1335_v26 = vld [vmem:[#allocation7 + $0x84] ss:$28 sps:$4 sm:$0xff]  }
 0x142   :  { %v1336_v28 = vld [vmem:[#allocation7 + $0x88] ss:$28 sps:$4 sm:$0xff]   ;;  %v1337_v30 = vld [vmem:[#allocation7 + $0xb8] ss:$28 sps:$4 sm:$0xff]  }
 0x143   :  { %v201_v31 = vpack.c.bf16 %v200_v29, %v200_v29  ;;  %v1339_v29 = vld [vmem:[#allocation7 + $0xbc] ss:$28 sps:$4 sm:$0xff]  }
 0x145   :  { %1199 = vmatmul.mubr.bf16.vlgmr.msra.gmra.mrb[0].mxu1 %v201_v31  ;;  %v1340_v31 = vld [vmem:[#allocation7 + $0xc0] ss:$28 sps:$4 sm:$0xff]  }
 0x146   :  { %818 = vmatpush1.bf16.msra.mxu1 %v1277_v34  ;;  %849 = vmatprep.mubr.bf16.mxu1 %v1489_v12  ;;  %v1344_v34 = vld [vmem:[#allocation7 + $0xf8] ss:$28 sps:$4 sm:$0xff]  }
 0x147   :  { %819 = vmatprep.subr.bf16.mxu1 %v1285_v37  ;;  %v1348_v37 = vld [vmem:[#allocation7 + $0x130] ss:$28 sps:$4 sm:$0xff]  }
 0x14a   :  { %820 = vmatpush1.bf16.msra.mxu1 %v1283_v38  ;;  %v1351_v38 = vld [vmem:[#allocation7 + $0x164] ss:$28 sps:$4 sm:$0xff]  }
 0x14b   :  { %821 = vmatprep.subr.bf16.mxu1 %v1291_v39  ;;  %v1349_v39 = vld [vmem:[#allocation7 + $0x160] ss:$28 sps:$4 sm:$0xff]  }
 0x14e   :  { %822 = vmatpush1.bf16.msra.mxu1 %v1289_v40  ;;  %v1352_v40 = vld [vmem:[#allocation7 + $0x168] ss:$28 sps:$4 sm:$0xff]  }
 0x14f   :  { %823 = vmatprep.subr.bf16.mxu1 %v1297_v41  ;;  %v1355_v41 = vld [vmem:[#allocation7 + $0x19c] ss:$28 sps:$4 sm:$0xff]  }
 0x152   :  { %824 = vmatpush1.bf16.msra.mxu1 %v1295_v42  ;;  %v1353_v42 = vld [vmem:[#allocation7 + $0x198] ss:$28 sps:$4 sm:$0xff]  }
 0x153   :  { %825 = vmatprep.subr.bf16.mxu1 %v1303_v43  ;;  %v1356_v43 = vld [vmem:[#allocation7 + $0x1a0] ss:$28 sps:$4 sm:$0xff]  }
 0x156   :  { %826 = vmatpush1.bf16.msra.mxu1 %v1301_v44  ;;  %v494_v44 = vlaneseq }
 0x157   :  { %827 = vmatprep.subr.bf16.mxu1 %v1309_v45 }
 0x158   :  { %v495_v45 = vshrl.u32 %v494_v44, 7 }
 0x15a   :  { %828 = vmatpush1.bf16.msra.mxu1 %v1307_v46  ;;  %v496_v46 = vsub.s32 0, %v495_v45 }
 0x15b   :  { %829 = vmatprep.subr.bf16.mxu1 %v1315_v47  ;;  %v504_v47 = vsub.s32 2, %v495_v45 }
 0x15e   :  { %830 = vmatpush1.bf16.msra.mxu1 %v1313_v48  ;;  %v492_v48 = vld [vmem:[%s1695_s8] sm:$0xff] }
 0x15f   :  { %831 = vmatprep.subr.bf16.mxu1 %v1321_v7 }
 0x162   :  { %832 = vmatpush1.bf16.msra.mxu1 %v1319_v9 }
 0x163   :  { %899 = vmatprep.subr.bf16.mxu1 %v1327_v11 }
 0x218   :  { %v307_v50 = vpop.f32.mrb[0].mxu1 }
 0x219   :  { %v308_v51 = vadd.f32 %v1052_v49, %v307_v50  ;;  %v1200_v52 = vpop.f32.mrb[1].mxu1  ;;  %v500_v49 = vsub.s32 1, %v495_v45  ;;  %v508_v50 = vsub.s32 3, %v495_v45 }
 0x21a   :  { %v310_v53 = vpop.f32.mrb[2].mxu1  ;;  %v505_v52 = vrot.slane %v492_v48, %v504_v47 }
 0x21b   :  { %v313_v54 = vmax.f32 %v308_v51, 0.0  ;;  %v1201_v55 = vpop.f32.mrb[3].mxu1  ;;  %v497_v51 = vrot.slane %v492_v48, %v496_v46  ;;  %v501_v53 = vrot.slane %v492_v48, %v500_v49 }
 0x21d   :  { %v314_v57 = vpack.c.bf16 %v313_v54, %v313_v54  ;;  %v509_v54 = vrot.slane %v492_v48, %v508_v50 }
 0x21f   :  { %1219 = vmatmul.mubr.bf16.vlgmr.msra.gmra.mrb[4].mxu0 %v314_v57 }
 0x220   :  { %859 = vmatpush1.bf16.msra.mxu0 %v1280_v56  ;;  %890 = vmatprep.mubr.bf16.mxu0 %v1489_v12 }
 0x221   :  { %860 = vmatprep.subr.bf16.mxu0 %v1288_v58 }
 0x224   :  { %861 = vmatpush1.bf16.msra.mxu0 %v1286_v59 }
 0x225   :  { %862 = vmatprep.subr.bf16.mxu0 %v1294_v60 }
 0x228   :  { %863 = vmatpush1.bf16.msra.mxu0 %v1292_v61 }
 0x229   :  { %864 = vmatprep.subr.bf16.mxu0 %v1300_v62 }
 0x22c   :  { %865 = vmatpush1.bf16.msra.mxu0 %v1298_v63 }
 0x22d   :  { %866 = vmatprep.subr.bf16.mxu0 %v1306_v1 }
 0x230   :  { %867 = vmatpush1.bf16.msra.mxu0 %v1304_v2 }
 0x231   :  { %868 = vmatprep.subr.bf16.mxu0 %v1312_v3 }
 0x234   :  { %869 = vmatpush1.bf16.msra.mxu0 %v1310_v4 }
 0x235   :  { %870 = vmatprep.subr.bf16.mxu0 %v1318_v5 }
 0x238   :  { %871 = vmatpush1.bf16.msra.mxu0 %v1316_v6 }
 0x239   :  { %872 = vmatprep.subr.bf16.mxu0 %v1324_v8 }
 0x23c   :  { %873 = vmatpush1.bf16.msra.mxu0 %v1322_v10 }
 0x23d   :  { %1222 = vmatprep.subr.bf16.mxu0 %v1487_v0 }
 0x2f2   :  { %v420_v14 = vpop.f32.mrb[4].mxu0 }
 0x2f3   :  { %v421_v15 = vadd.f32 %v1061_v13, %v420_v14  ;;  %v1220_v16 = vpop.f32.mrb[5].mxu0 }
 0x2f4   :  { %v423_v17 = vpop.f32.mrb[6].mxu0 }
 0x2f5   :  { %v426_v18 = vmax.f32 %v421_v15, 0.0  ;;  %v1221_v19 = vpop.f32.mrb[7].mxu0 }
 0x2f6   :  { %v512_v19 = vsub.s32 4, %v495_v45 }
 0x2f7   :  { %v427_v22 = vpack.c.bf16 %v426_v18, %v426_v18 }
 0x2f9   :  { %850 = vmatmul.mubr.bf16.vlgmr.msra.gmra.mrb[4].mxu1 %v427_v22  ;;  %891 = vmatmul.mubr.bf16.vlgmr.msra.gmra.mrb[8].mxu0 %v427_v22 }
 0x2fa   :  { %900 = vmatpush1.bf16.msra.mxu1 %v1325_v20  ;;  %1223 = vmatpush3.bf16.msra.mxu0 %v1328_v21  ;;  %v520_v20 = vsub.s32 6, %v495_v45  ;;  %v516_v21 = vsub.s32 5, %v495_v45 }
 0x2fb   :  { %901 = vmatprep.subr.bf16.mxu1 %v1331_v23  ;;  %1224 = vmatprep.subr.bf16.mxu0 %v1487_v0 }
 0x2fc   :  { %931 = vmatprep.mubr.bf16.mxu1 %v1489_v12  ;;  %1238 = vmatprep.mubr.msk.bf16.mxu0 %vm1488_vm0, %v1487_v0  ;;  %v521_v23 = vrot.slane %v492_v48, %v520_v20 }
 0x2fe   :  { %902 = vmatpush1.bf16.msra.mxu1 %v1329_v24  ;;  %1225 = vmatpush3.bf16.msra.mxu0 %v1332_v25  ;;  %v517_v25 = vrot.slane %v492_v48, %v516_v21 }
 0x2ff   :  { %903 = vmatprep.subr.bf16.mxu1 %v1335_v26  ;;  %1226 = vmatprep.subr.bf16.mxu0 %v1487_v0 }
 0x302   :  { %904 = vmatpush1.bf16.msra.mxu1 %v1333_v27  ;;  %1227 = vmatpush3.bf16.msra.mxu0 %v1336_v28 }
 0x303   :  { %905 = vmatprep.subr.bf16.mxu1 %v1339_v29  ;;  %1228 = vmatprep.subr.bf16.mxu0 %v1487_v0 }
 0x306   :  { %906 = vmatpush1.bf16.msra.mxu1 %v1337_v30  ;;  %1229 = vmatpush3.bf16.msra.mxu0 %v1340_v31 }
 0x307   :  { %907 = vmatprep.subr.bf16.mxu1 %v1343_v32  ;;  %1230 = vmatprep.subr.bf16.mxu0 %v1487_v0 }
 0x30a   :  { %908 = vmatpush1.bf16.msra.mxu1 %v1341_v33  ;;  %1231 = vmatpush3.bf16.msra.mxu0 %v1344_v34 }
 0x30b   :  { %909 = vmatprep.subr.bf16.mxu1 %v1347_v35  ;;  %1232 = vmatprep.subr.bf16.mxu0 %v1487_v0 }
 0x30e   :  { %910 = vmatpush1.bf16.msra.mxu1 %v1345_v36  ;;  %1233 = vmatpush3.bf16.msra.mxu0 %v1348_v37 }
 0x30f   :  { %911 = vmatprep.subr.bf16.mxu1 %v1351_v38  ;;  %1234 = vmatprep.subr.bf16.mxu0 %v1487_v0 }
 0x312   :  { %912 = vmatpush1.bf16.msra.mxu1 %v1349_v39  ;;  %1235 = vmatpush3.bf16.msra.mxu0 %v1352_v40 }
 0x313   :  { %913 = vmatprep.subr.bf16.mxu1 %v1355_v41  ;;  %1236 = vmatprep.subr.bf16.mxu0 %v1487_v0 }
 0x316   :  { %914 = vmatpush1.bf16.msra.mxu1 %v1353_v42  ;;  %1237 = vmatpush3.bf16.msra.mxu0 %v1356_v43 }
 0x319   :  { %932 = vmatmul.mubr.bf16.vlgmr.msra.gmra.mrb[8].mxu1 %v427_v22  ;;  %1239 = vmatmul.mubr.bf16.vlgmr.msra.gmra.mrb[12].mxu0 %v427_v22  ;;  %v513_v22 = vrot.slane %v492_v48, %v512_v19 }
 0x3cc   :  { %v851_v55 = vpop.f32.mrb[4].mxu1  ;;  %v892_v0 = vpop.f32.mrb[8].mxu0 }
 0x3cd   :  { %v852_v56 = vadd.f32 %v851_v55, %v497_v51  ;;  %v893_v57 = vadd.f32 %v892_v0, %v505_v52  ;;  %v853_v58 = vpop.f32.mrb[5].mxu1  ;;  %v894_v59 = vpop.f32.mrb[9].mxu0 }
 0x3ce   :  { %v854_v60 = vadd.f32 %v853_v58, %v501_v53  ;;  %v895_v61 = vadd.f32 %v894_v59, %v509_v54  ;;  %v855_v62 = vpop.f32.mrb[6].mxu1  ;;  %v896_v63 = vpop.f32.mrb[10].mxu0 }
 0x3cf   :  { %v980_v1 = vsub.f32 0.0, %v852_v56  ;;  %v982_v2 = vsub.f32 0.0, %v893_v57  ;;  %v856_v3 = vpop.f32.mrb[7].mxu1  ;;  %v897_v4 = vpop.f32.mrb[11].mxu0 }
 0x3d0   :  { %v981_v5 = vsub.f32 0.0, %v854_v60  ;;  %v983_v6 = vsub.f32 0.0, %v895_v61 }
 0x3d1   :  { %v987_v7 = vmul.f32 1.442695, %v980_v1  ;;  %v991_v8 = vmul.f32 1.442695, %v982_v2 }
 0x3d2   :  { %v989_v9 = vmul.f32 1.442695, %v981_v5  ;;  %v993_v10 = vmul.f32 1.442695, %v983_v6 }
 0x3d3   :  { %1357 = vpow2.f32 %v987_v7 }
 0x3d4   :  { %1359 = vpow2.f32 %v991_v8 }
 0x3d5   :  { %1361 = vpow2.f32 %v989_v9 }
 0x3d6   :  { %1363 = vpow2.f32 %v993_v10 }
 0x3dd   :  { %v1358_v11 = vpop.eup %1357 }
 0x3de   :  { %v1360_v12 = vpop.eup %1359  ;;  %v1001_v13 = vadd.f32 1.0, %v1358_v11 }
 0x3df   :  { %v1362_v14 = vpop.eup %1361  ;;  %v1003_v15 = vadd.f32 1.0, %v1360_v12 }
 0x3e0   :  { %v1364_v16 = vpop.eup %1363  ;;  %1365 = vrcp.f32 %v1001_v13  ;;  %v1002_v17 = vadd.f32 1.0, %v1362_v14 }
 0x3e1   :  { %1367 = vrcp.f32 %v1003_v15  ;;  %v1004_v18 = vadd.f32 1.0, %v1364_v16 }
 0x3e2   :  { %1369 = vrcp.f32 %v1002_v17 }
 0x3e3   :  { %1371 = vrcp.f32 %v1004_v18 }
 0x3ea   :  { %v1366_v24 = vpop.eup %1365 }
 0x3eb   :  { %v1368_v26 = vpop.eup %1367  ;;  %v1015_v27 = vmax.f32 %v1366_v24, 1e-06 }
 0x3ec   :  { %v1370_v28 = vpop.eup %1369  ;;  %v1017_v29 = vmax.f32 %v1368_v26, 1e-06  ;;  %v933_v30 = vpop.f32.mrb[8].mxu1 }
 0x3ed   :  { %v974_v31 = vpop.f32.mrb[12].mxu0  ;;  %v1372_v32 = vpop.eup %1371  ;;  %v1022_v33 = vmin.f32 %v1015_v27, 0.999999  ;;  %v1016_v34 = vmax.f32 %v1370_v28, 1e-06  ;;  %v934_v35 = vadd.f32 %v933_v30, %v513_v22 }
 0x3ee   :  { %v975_v36 = vadd.f32 %v974_v31, %v521_v23  ;;  %v935_v37 = vpop.f32.mrb[9].mxu1  ;;  %v1240_v38 = vpop.f32.mrb[13].mxu0  ;;  %v1024_v39 = vmin.f32 %v1017_v29, 0.999999  ;;  %v1018_v40 = vmax.f32 %v1372_v32, 1e-06 }
 0x3ef   :  { %v936_v41 = vadd.f32 %v935_v37, %v517_v25  ;;  %v937_v42 = vpop.f32.mrb[10].mxu1  ;;  %v977_v43 = vpop.f32.mrb[14].mxu0  ;;  %1029 = vst [vmem:[%s1696_s9] sm:$0xff] %v1022_v33  ;;  %v1023_v44 = vmin.f32 %v1016_v34, 0.999999  ;;  %v984_v45 = vsub.f32 0.0, %v934_v35 }
 0x3f0   :  { %v986_v46 = vsub.f32 0.0, %v975_v36  ;;  %v938_v47 = vpop.f32.mrb[11].mxu1  ;;  %v1241_v48 = vpop.f32.mrb[15].mxu0  ;;  %1031 = vst [vmem:[%s1696_s9 + $0x10] sm:$0xff] %v1024_v39  ;;  %v1025_v49 = vmin.f32 %v1018_v40, 0.999999 }
 0x3f1   :  { %v985_v50 = vsub.f32 0.0, %v936_v41  ;;  %1030 = vst [vmem:[%s1696_s9 + $0x8] sm:$0xff] %v1023_v44  ;;  %v995_v51 = vmul.f32 1.442695, %v984_v45 }
 0x3f2   :  { %v999_v52 = vmul.f32 1.442695, %v986_v46  ;;  %1032 = vst [vmem:[%s1696_s9 + $0x18] sm:$0xff] %v1025_v49 }
 0x3f3   :  { %v997_v53 = vmul.f32 1.442695, %v985_v50  ;;  %1373 = vpow2.f32 %v995_v51 }
 0x3f4   :  { %1375 = vpow2.f32 %v999_v52 }
 0x3f5   :  { %1377 = vpow2.f32 %v997_v53 }
 0x3fd   :  { %v1374_v54 = vpop.eup %1373 }
 0x3fe   :  { %v1376_v55 = vpop.eup %1375  ;;  %v1005_v0 = vadd.f32 1.0, %v1374_v54 }
 0x3ff   :  { %v1378_v56 = vpop.eup %1377  ;;  %v1007_v57 = vadd.f32 1.0, %v1376_v55 }
 0x400   :  { %1379 = vrcp.f32 %v1005_v0  ;;  %v1006_v58 = vadd.f32 1.0, %v1378_v56 }
 0x401   :  { %1381 = vrcp.f32 %v1007_v57 }
 0x402   :  { %1383 = vrcp.f32 %v1006_v58 }
 0x40a   :  { %v1380_v59 = vpop.eup %1379 }
 0x40b   :  { %v1382_v60 = vpop.eup %1381  ;;  %v1019_v61 = vmax.f32 %v1380_v59, 1e-06 }
 0x40c   :  { %v1384_v62 = vpop.eup %1383  ;;  %v1021_v63 = vmax.f32 %v1382_v60, 1e-06 }
 0x40d   :  { %v1026_v1 = vmin.f32 %v1019_v61, 0.999999  ;;  %v1020_v2 = vmax.f32 %v1384_v62, 1e-06 }
 0x40e   :  { %v1028_v3 = vmin.f32 %v1021_v63, 0.999999 }
 0x40f   :  { %1033 = vst [vmem:[%s1696_s9 + $0x20] sm:$0xff] %v1026_v1  ;;  %v1027_v4 = vmin.f32 %v1020_v2, 0.999999 }
 0x410   :  { %1035 = vst [vmem:[%s1696_s9 + $0x30] sm:$0xff] %v1028_v3 }
 0x411   :  { %1034 = vst [vmem:[%s1696_s9 + $0x28] sm:$0xff] %v1027_v4 }
 0x412   :  { %1040 = vsyncpa [#allocation3], 1 }
 0x413   :  { %1041 = vsyncpa [#allocation5], 1 }
 0x414   :  { %1042 = vsyncpa [#allocation8], 1 }

</bundles_post_ra>
